<compile_context>
chip_gen: v6e
topology: v6e:2x2x1
jax: 0.10.0
libtpu: 0.0.40
codegen_flags: <defaults>
</compile_context>

<pallas_src>
import functools

import jax
import jax.numpy as jnp
from jax.experimental import pallas as pl
from jax.experimental.pallas import tpu as pltpu

EPS = 1e-5


# ---------------------------- kernel ----------------------------
def _feature_mixing_kernel(x_ref, scale_ref, shift_ref, w1_ref, b1_ref,
                           w2_ref, b2_ref, *rest, bt, has_proj):
    if has_proj:
        wp_ref, bp_ref, out_ref = rest
    else:
        (out_ref,) = rest

    x = x_ref[...].astype(jnp.float32)                        # (TM, Cin), TM = bt*S
    tm, cin = x.shape
    s = scale_ref.shape[0]

    # Folded BatchNorm affine: scale/shift are per-(s, c); broadcast over the bt
    # sequences packed into this row tile.
    x3 = x.reshape(bt, s, cin)
    xn = (x3 * scale_ref[...][None, :, :] + shift_ref[...][None, :, :]).reshape(tm, cin)

    h = jnp.dot(xn, w1_ref[...].astype(jnp.float32),
                preferred_element_type=jnp.float32) + b1_ref[...]
    h = jnp.maximum(h, 0.0)                                   # relu
    y = jnp.dot(h, w2_ref[...].astype(jnp.float32),
                preferred_element_type=jnp.float32) + b2_ref[...]

    if has_proj:
        xp = jnp.dot(x, wp_ref[...].astype(jnp.float32),
                     preferred_element_type=jnp.float32) + bp_ref[...]
    else:
        xp = x                                                # identity projection
    out_ref[...] = (xp + y).astype(out_ref.dtype)


# ---------------------------- wrapper ----------------------------
def _choose_bt(B, S, bytes_per_seq, max_tile_bytes):
    """Sequences per grid step: ~max_tile_bytes streamed per step, >=2 steps when B>=2,
    and bt*S a multiple of 8 (sublane constraint) unless we fall back to one full tile."""
    bt_cap = max(1, min(B, max_tile_bytes // max(bytes_per_seq, 1)))
    if B >= 2:
        bt_cap = min(bt_cap, max(1, B // 2))
    for bt in range(bt_cap, 0, -1):
        if B % bt == 0 and (bt * S) % 8 == 0:
            return bt
    return B  # single grid step: block shape == full array, no divisibility constraint


def feature_mixing(x, params, *, eps=EPS, max_tile_bytes=4 << 20):
    """Inference-mode FeatureMixing forward (normalize_before=True, dropout off)."""
    # TODO(synk): TimeBatchNorm2d uses inference semantics (running stats folded into a
    #             per-(s,c) scale/shift); training-mode batch statistics / running-stat
    #             updates and the normalize_before=False (norm_after) path are not implemented.
    # TODO(synk): nn.Dropout is identity here (inference-mode forward).
    B, S, Cin = x.shape
    w1, b1 = params["w1"], params["b1"]
    w2, b2 = params["w2"], params["b2"]
    FF = w1.shape[1]
    Cout = w2.shape[1]
    has_proj = params.get("wp") is not None
    if not has_proj:
        assert Cin == Cout, "identity projection requires input_channels == output_channels"

    # Fold BatchNorm (gamma, beta, running mean/var over the flattened (S, Cin) features)
    # into a single per-(s, c) scale/shift -> no per-element divide/rsqrt in the kernel.
    gamma = params["bn_gamma"].reshape(S, Cin).astype(jnp.float32)
    beta = params["bn_beta"].reshape(S, Cin).astype(jnp.float32)
    mean = params["bn_mean"].reshape(S, Cin).astype(jnp.float32)
    var = params["bn_var"].reshape(S, Cin).astype(jnp.float32)
    scale = gamma * jax.lax.rsqrt(var + eps)
    shift = beta - mean * scale

    bytes_per_seq = S * (Cin + Cout + FF) * 4
    bt = _choose_bt(B, S, bytes_per_seq, max_tile_bytes)
    TM = bt * S
    grid = (B // bt,)

    # Present streamed data as lane-dense 2-D slabs (feature dim last).
    x2 = x.reshape(B * S, Cin)
    b1r = b1.reshape(1, FF).astype(jnp.float32)
    b2r = b2.reshape(1, Cout).astype(jnp.float32)

    def const2d(shape):
        # Constant block index across the grid -> DMA'd once, stays resident in VMEM.
        return pl.BlockSpec(shape, lambda i: (0, 0))

    in_specs = [
        pl.BlockSpec((TM, Cin), lambda i: (i, 0)),   # x rows (streamed)
        const2d((S, Cin)),                           # folded BN scale
        const2d((S, Cin)),                           # folded BN shift
        const2d((Cin, FF)),                          # W1
        const2d((1, FF)),                            # b1
        const2d((FF, Cout)),                         # W2
        const2d((1, Cout)),                          # b2
    ]
    args = [x2, scale, shift, w1, b1r, w2, b2r]

    if has_proj:
        in_specs += [const2d((Cin, Cout)), const2d((1, Cout))]
        args += [params["wp"], params["bp"].reshape(1, Cout).astype(jnp.float32)]

    kernel = functools.partial(_feature_mixing_kernel, bt=bt, has_proj=has_proj)

    out2 = pl.pallas_call(
        kernel,
        out_shape=jax.ShapeDtypeStruct((B * S, Cout), x.dtype),
        grid_spec=pltpu.PrefetchScalarGridSpec(
            num_scalar_prefetch=0,
            grid=grid,
            in_specs=in_specs,
            out_specs=pl.BlockSpec((TM, Cout), lambda i: (i, 0)),
        ),
        compiler_params=pltpu.CompilerParams(
            dimension_semantics=("parallel",)),
    )(*args)
    return out2.reshape(B, S, Cout)


# ----------------- pure-JAX reference (mirrors the PyTorch module) -----------------
def _ref_feature_mixing(x, params, eps=EPS):
    hp = jax.lax.Precision.HIGHEST
    B, S, Cin = x.shape
    gamma = params["bn_gamma"].reshape(1, S, Cin)
    beta = params["bn_beta"].reshape(1, S, Cin)
    mean = params["bn_mean"].reshape(1, S, Cin)
    var = params["bn_var"].reshape(1, S, Cin)
    xn = (x - mean) / jnp.sqrt(var + eps) * gamma + beta
    h = jnp.maximum(jnp.matmul(xn, params["w1"], precision=hp) + params["b1"], 0.0)
    y = jnp.matmul(h, params["w2"], precision=hp) + params["b2"]
    if params.get("wp") is not None:
        xp = jnp.matmul(x, params["wp"], precision=hp) + params["bp"]
    else:
        xp = x
    return xp + y


def _make_params(key, S, Cin, Cout, FF, with_proj):
    ks = jax.random.split(key, 10)
    p = {
        "bn_gamma": 1.0 + 0.1 * jax.random.normal(ks[0], (S * Cin,), jnp.float32),
        "bn_beta": 0.1 * jax.random.normal(ks[1], (S * Cin,), jnp.float32),
        "bn_mean": 0.2 * jax.random.normal(ks[2], (S * Cin,), jnp.float32),
        "bn_var": 0.5 + 0.3 * jnp.abs(jax.random.normal(ks[3], (S * Cin,), jnp.float32)),
        "w1": 0.05 * jax.random.normal(ks[4], (Cin, FF), jnp.float32),
        "b1": 0.05 * jax.random.normal(ks[5], (FF,), jnp.float32),
        "w2": 0.05 * jax.random.normal(ks[6], (FF, Cout), jnp.float32),
        "b2": 0.05 * jax.random.normal(ks[7], (Cout,), jnp.float32),
        "wp": None,
        "bp": None,
    }
    if with_proj:
        p["wp"] = 0.05 * jax.random.normal(ks[8], (Cin, Cout), jnp.float32)
        p["bp"] = 0.05 * jax.random.normal(ks[9], (Cout,), jnp.float32)
    return p


if __name__ == "__main__":
    key = jax.random.PRNGKey(0)
    kx, kp1, kp2 = jax.random.split(key, 3)

    # sequence_length=16, input_channels=32, output_channels=64, ff_dim=128, batch=4
    B, S, Cin, Cout, FF = 4, 16, 32, 64, 128
    x = jax.random.normal(kx, (B, S, Cin), dtype=jnp.float32)

    # Path 1: input_channels != output_channels -> linear projection residual.
    params = _make_params(kp1, S, Cin, Cout, FF, with_proj=True)
    out = feature_mixing(x, params)
    jax.block_until_ready(out)
    ref = _ref_feature_mixing(x, params)
    assert out.shape == (B, S, Cout)
    assert jnp.allclose(out, ref, atol=1e-2, rtol=1e-2)

    # Path 2: input_channels == output_channels -> identity projection residual.
    params2 = _make_params(kp2, S, Cin, Cin, FF, with_proj=False)
    out2 = feature_mixing(x, params2)
    jax.block_until_ready(out2)
    ref2 = _ref_feature_mixing(x, params2)
    assert out2.shape == (B, S, Cin)
    assert jnp.allclose(out2, ref2, atol=1e-2, rtol=1e-2)

    print("KERNEL_OK")
</pallas_src>

<mosaic_0001>
module attributes {stable_mosaic.version = 11 : i64} {
  func.func @_feature_mixing_kernel(%arg0: i32, %arg1: memref<32x32xf32, #tpu.memory_space<vmem>>, %arg2: memref<16x32xf32, #tpu.memory_space<vmem>>, %arg3: memref<16x32xf32, #tpu.memory_space<vmem>>, %arg4: memref<32x128xf32, #tpu.memory_space<vmem>>, %arg5: memref<1x128xf32, #tpu.memory_space<vmem>>, %arg6: memref<128x64xf32, #tpu.memory_space<vmem>>, %arg7: memref<1x64xf32, #tpu.memory_space<vmem>>, %arg8: memref<32x64xf32, #tpu.memory_space<vmem>>, %arg9: memref<1x64xf32, #tpu.memory_space<vmem>>, %arg10: memref<32x64xf32, #tpu.memory_space<vmem>>) attributes {dimension_semantics = [#tpu.dimension_semantics<parallel>], iteration_bounds = array<i64: 2>, scalar_prefetch = 0 : i64, scratch_operands = 0 : i64, tpu.core_type = #tpu.core_type<tc>, window_params = [{transform_indices = @transform_0, window_bounds = array<i64: 32, 32>}, {pipeline_mode = #tpu.pipeline_mode<synchronous>, transform_indices = @transform_1, window_bounds = array<i64: 16, 32>}, {pipeline_mode = #tpu.pipeline_mode<synchronous>, transform_indices = @transform_2, window_bounds = array<i64: 16, 32>}, {pipeline_mode = #tpu.pipeline_mode<synchronous>, transform_indices = @transform_3, window_bounds = array<i64: 32, 128>}, {pipeline_mode = #tpu.pipeline_mode<synchronous>, transform_indices = @transform_4, window_bounds = array<i64: 1, 128>}, {pipeline_mode = #tpu.pipeline_mode<synchronous>, transform_indices = @transform_5, window_bounds = array<i64: 128, 64>}, {pipeline_mode = #tpu.pipeline_mode<synchronous>, transform_indices = @transform_6, window_bounds = array<i64: 1, 64>}, {pipeline_mode = #tpu.pipeline_mode<synchronous>, transform_indices = @transform_7, window_bounds = array<i64: 32, 64>}, {pipeline_mode = #tpu.pipeline_mode<synchronous>, transform_indices = @transform_8, window_bounds = array<i64: 1, 64>}, {transform_indices = @transform_9, window_bounds = array<i64: 32, 64>}]} {
    %c0 = arith.constant 0 : index
    %c0_0 = arith.constant 0 : index
    %0 = vector.load %arg1[%c0, %c0_0] : memref<32x32xf32, #tpu.memory_space<vmem>>, vector<32x32xf32>
    %1 = vector.shape_cast %0 : vector<32x32xf32> to vector<2x16x32xf32>
    %c0_1 = arith.constant 0 : index
    %c0_2 = arith.constant 0 : index
    %2 = vector.load %arg2[%c0_1, %c0_2] : memref<16x32xf32, #tpu.memory_space<vmem>>, vector<16x32xf32>
    %3 = vector.shape_cast %2 : vector<16x32xf32> to vector<1x16x32xf32>
    %4 = vector.broadcast %3 : vector<1x16x32xf32> to vector<2x16x32xf32>
    %5 = arith.mulf %1, %4 : vector<2x16x32xf32>
    %c0_3 = arith.constant 0 : index
    %c0_4 = arith.constant 0 : index
    %6 = vector.load %arg3[%c0_3, %c0_4] : memref<16x32xf32, #tpu.memory_space<vmem>>, vector<16x32xf32>
    %7 = vector.shape_cast %6 : vector<16x32xf32> to vector<1x16x32xf32>
    %8 = vector.broadcast %7 : vector<1x16x32xf32> to vector<2x16x32xf32>
    %9 = arith.addf %5, %8 : vector<2x16x32xf32>
    %10 = vector.shape_cast %9 : vector<2x16x32xf32> to vector<32x32xf32>
    %c0_5 = arith.constant 0 : index
    %c0_6 = arith.constant 0 : index
    %11 = vector.load %arg4[%c0_5, %c0_6] : memref<32x128xf32, #tpu.memory_space<vmem>>, vector<32x128xf32>
    %cst = arith.constant dense<0.000000e+00> : vector<32x128xf32>
    %12 = tpu.matmul %10, %11, %cst {dimension_numbers = #tpu.dot_dimension_numbers<[1], [0], [0], [1], [0, 0, 1, 1], [], []>} : vector<32x32xf32>, vector<32x128xf32>, vector<32x128xf32> -> vector<32x128xf32>
    %c0_7 = arith.constant 0 : index
    %c0_8 = arith.constant 0 : index
    %13 = vector.load %arg5[%c0_7, %c0_8] : memref<1x128xf32, #tpu.memory_space<vmem>>, vector<1x128xf32>
    %14 = vector.broadcast %13 : vector<1x128xf32> to vector<32x128xf32>
    %15 = arith.addf %12, %14 : vector<32x128xf32>
    %cst_9 = arith.constant 0.000000e+00 : f32
    %16 = vector.broadcast %cst_9 : f32 to vector<32x128xf32>
    %17 = arith.maximumf %15, %16 : vector<32x128xf32>
    %c0_10 = arith.constant 0 : index
    %c0_11 = arith.constant 0 : index
    %18 = vector.load %arg6[%c0_10, %c0_11] : memref<128x64xf32, #tpu.memory_space<vmem>>, vector<128x64xf32>
    %cst_12 = arith.constant dense<0.000000e+00> : vector<32x64xf32>
    %19 = tpu.matmul %17, %18, %cst_12 {dimension_numbers = #tpu.dot_dimension_numbers<[1], [0], [0], [1], [0, 0, 1, 1], [], []>} : vector<32x128xf32>, vector<128x64xf32>, vector<32x64xf32> -> vector<32x64xf32>
    %c0_13 = arith.constant 0 : index
    %c0_14 = arith.constant 0 : index
    %20 = vector.load %arg7[%c0_13, %c0_14] : memref<1x64xf32, #tpu.memory_space<vmem>>, vector<1x64xf32>
    %21 = vector.broadcast %20 : vector<1x64xf32> to vector<32x64xf32>
    %22 = arith.addf %19, %21 : vector<32x64xf32>
    %c0_15 = arith.constant 0 : index
    %c0_16 = arith.constant 0 : index
    %23 = vector.load %arg8[%c0_15, %c0_16] : memref<32x64xf32, #tpu.memory_space<vmem>>, vector<32x64xf32>
    %cst_17 = arith.constant dense<0.000000e+00> : vector<32x64xf32>
    %24 = tpu.matmul %0, %23, %cst_17 {dimension_numbers = #tpu.dot_dimension_numbers<[1], [0], [0], [1], [0, 0, 1, 1], [], []>} : vector<32x32xf32>, vector<32x64xf32>, vector<32x64xf32> -> vector<32x64xf32>
    %c0_18 = arith.constant 0 : index
    %c0_19 = arith.constant 0 : index
    %25 = vector.load %arg9[%c0_18, %c0_19] : memref<1x64xf32, #tpu.memory_space<vmem>>, vector<1x64xf32>
    %26 = vector.broadcast %25 : vector<1x64xf32> to vector<32x64xf32>
    %27 = arith.addf %24, %26 : vector<32x64xf32>
    %28 = arith.addf %27, %22 : vector<32x64xf32>
    %c0_20 = arith.constant 0 : index
    %c0_21 = arith.constant 0 : index
    %29 = vector.load %arg10[%c0_20, %c0_21] : memref<32x64xf32, #tpu.memory_space<vmem>>, vector<32x64xf32>
    tpu.vector_store %arg10[%c0_20, %c0_21], %28 {strides = array<i32>} : memref<32x64xf32, #tpu.memory_space<vmem>>, vector<32x64xf32>,
    return
  }
  func.func @transform_0(%arg0: i32) -> (i32, i32) {
    %c0_i32 = arith.constant 0 : i32
    %c0_i32_0 = arith.constant 0 : i32
    return %arg0, %c0_i32 : i32, i32
  }
  func.func @transform_1(%arg0: i32) -> (i32, i32) {
    %c0_i32 = arith.constant 0 : i32
    %c0_i32_0 = arith.constant 0 : i32
    %c0_i32_1 = arith.constant 0 : i32
    return %c0_i32, %c0_i32_0 : i32, i32
  }
  func.func @transform_2(%arg0: i32) -> (i32, i32) {
    %c0_i32 = arith.constant 0 : i32
    %c0_i32_0 = arith.constant 0 : i32
    %c0_i32_1 = arith.constant 0 : i32
    return %c0_i32, %c0_i32_0 : i32, i32
  }
  func.func @transform_3(%arg0: i32) -> (i32, i32) {
    %c0_i32 = arith.constant 0 : i32
    %c0_i32_0 = arith.constant 0 : i32
    %c0_i32_1 = arith.constant 0 : i32
    return %c0_i32, %c0_i32_0 : i32, i32
  }
  func.func @transform_4(%arg0: i32) -> (i32, i32) {
    %c0_i32 = arith.constant 0 : i32
    %c0_i32_0 = arith.constant 0 : i32
    %c0_i32_1 = arith.constant 0 : i32
    return %c0_i32, %c0_i32_0 : i32, i32
  }
  func.func @transform_5(%arg0: i32) -> (i32, i32) {
    %c0_i32 = arith.constant 0 : i32
    %c0_i32_0 = arith.constant 0 : i32
    %c0_i32_1 = arith.constant 0 : i32
    return %c0_i32, %c0_i32_0 : i32, i32
  }
  func.func @transform_6(%arg0: i32) -> (i32, i32) {
    %c0_i32 = arith.constant 0 : i32
    %c0_i32_0 = arith.constant 0 : i32
    %c0_i32_1 = arith.constant 0 : i32
    return %c0_i32, %c0_i32_0 : i32, i32
  }
  func.func @transform_7(%arg0: i32) -> (i32, i32) {
    %c0_i32 = arith.constant 0 : i32
    %c0_i32_0 = arith.constant 0 : i32
    %c0_i32_1 = arith.constant 0 : i32
    return %c0_i32, %c0_i32_0 : i32, i32
  }
  func.func @transform_8(%arg0: i32) -> (i32, i32) {
    %c0_i32 = arith.constant 0 : i32
    %c0_i32_0 = arith.constant 0 : i32
    %c0_i32_1 = arith.constant 0 : i32
    return %c0_i32, %c0_i32_0 : i32, i32
  }
  func.func @transform_9(%arg0: i32) -> (i32, i32) {
    %c0_i32 = arith.constant 0 : i32
    %c0_i32_0 = arith.constant 0 : i32
    return %arg0, %c0_i32 : i32, i32
  }
}

</mosaic_0001>

<bundles_post_ra>
// kernel: tpu_custom_call.1
= control target key start
LH: loop header
LB: loop body
LE: loop exit
PB: predicated region body
PF: predicated region fallthrough
CT: control target
= control target key end

     0   :  { %14 = vsyncpa [#allocation3], 0  ;;  %s1268_s0 = inlined_call_operand.vmem [shape: f32[64,32], index: 0, kind: input, shape index: {}]   ;;  %s1269_s1 = inlined_call_operand.vmem [shape: f32[16,32], index: 1, kind: input, shape index: {}]   ;;  %s1270_s2 = inlined_call_operand.vmem [shape: f32[16,32], index: 2, kind: input, shape index: {}]   ;;  %s1271_s3 = inlined_call_operand.vmem [shape: f32[32,128], index: 3, kind: input, shape index: {}]   ;;  %s1272_s4 = inlined_call_operand.vmem [shape: f32[1,128], index: 4, kind: input, shape index: {}]   ;;  %s1273_s5 = inlined_call_operand.vmem [shape: f32[128,64], index: 5, kind: input, shape index: {}]   ;;  %s1274_s6 = inlined_call_operand.vmem [shape: f32[1,64], index: 6, kind: input, shape index: {}]   ;;  %s1275_s7 = inlined_call_operand.vmem [shape: f32[32,64], index: 7, kind: input, shape index: {}]   ;;  %s1276_s8 = inlined_call_operand.vmem [shape: f32[1,64], index: 8, kind: input, shape index: {}]   ;;  %s1277_s9 = inlined_call_operand.hbm [shape: f32[64,64], index: 9, kind: output, shape index: {}]  }
   0x1   :  { %16 = vsyncpa [#allocation3 + $0x1], 0  ;;  %s1046_s30 = smov 0   ;;  %s1048_s10 = smov 0  }
   0x2   :  { %s1050_s11 = smov 0   ;;  %s1052_s12 = smov 0  }
   0x3 LB: > { %s1067_s13 = sadd.s32 4294967295, %s991_s12   ;;  %s764_s14 = sadd.s32 4294967294, %s991_s12   ;;  %s991_s12 = sphi %s1052_s12, %s1283_s12   ;;  %s987_s11 = sphi %s1050_s11, %s1282_s11   ;;  %s983_s10 = sphi %s1048_s10, %s1281_s10   ;;  %s979_s30 = sphi %s1046_s30, %s1280_s30  }
   0x4   : > { %s1071_s15 = sadd.s32 1, %s991_s12   ;;  %s223_s16 = sadd.s32 1, %s987_s11 }
   0x5   : > { %s220_s17 = ssub.s32 %s991_s12, %s1071_s15  ;;  %p233_p0 = scmp.ne.s32.totalorder %s987_s11, %s983_s10 }
   0x6   : > { %p221_p1 = scmp.eq.s32.totalorder %s220_s17, 0  ;;  %p234_p2 = scmp.eq.s32.totalorder %s1067_s13, 1 }
   0x7   : > { %p239_p3 = scmp.ne.s32.totalorder %s983_s10, %s979_s30  ;;  %p240_p4 = scmp.eq.s32.totalorder %s764_s14, 1 }
   0x8   : > { %s1082_s18 = scalar_select %p221_p1, %s987_s11, %s223_s16  }
   0x9   : > { %p1084_p5 = por %p234_p2, %p233_p0  ;;  %p1088_p6 = por %p240_p4, %p239_p3 }
   0xa   : > { %p767_p7 = scmp.ge.s32.totalorder %s991_s12, 1  ;;  %p291_p8 = scmp.lt.s32.totalorder %s991_s12, 3 }
   0xc   : > { %p292_p9 = pnand %p767_p7, %p291_p8 }
   0xd   : > { %s769_s25 = sshll.u32 (!%p292_p9), %s1067_s13, 2  ;;  %s324_s28 = sand.u32 (!%p292_p9), 1, %s983_s10  }
   0xe   : > { %295 = sbr.rel (%p292_p9) target bundleno = 447 (0x1bf), region = 56  ;;  %p328_p10 = scmp.lt.s32.totalorder (!%p292_p9), %s769_s25, 7 }
   0xf   : > { %s768_s14 = sshll.u32 (!%p292_p9), %s324_s28, 5  ;;  %s787_s21 = sshll.u32 (!%p292_p9), %s1067_s13, 9 }
  0x10   : > { %s326_s16 = scalar_lea.vmem (!%p292_p9), [#allocation2], %s768_s14  ;;  %s1228_s13 = scalar_lea.sflag (!%p292_p9), [#allocation3], %s324_s28 }
  0x11   : > { %s702_s17 = sshll.u32 (!%p292_p9), %s326_s16, 4  ;;  %s993_s27 = smov (!%p292_p9), [#allocation2]   ;;  %s1222_s17 = int_to_ptr.vmem [resolvable:$true] %s702_s17 }
  0x12   : > { %s931_s26 = scalar_lea.vmem (!%p292_p9), %s1222_s17, 512  ;;  %s935_s29 = sshll.u32 (!%p292_p9), %s993_s27, 4  ;;  %s936_s29 = int_to_ptr.vmem [resolvable:$false] %s935_s29 }
  0x13   : > { %v353_v0 = vld [vmem:[%s1271_s3 + $0x18] sm:$0xff]  ;;  %v352_v1 = vld [vmem:[%s1271_s3 + $0x10] sm:$0xff]  ;;  %v351_v2 = vld [vmem:[%s1271_s3 + $0x8] sm:$0xff]  ;;  %s1285_s25 = smov (!%p328_p10, %s769_s25), 7  ;;  %vm361_vm0 = vcmask 261120   ;;  %vm683_vm1 = vcmask 523264   ;;  %p932_p11 = scmp.ne.s32.totalorder %s1222_s17, %s931_s26 }
  0x14   : > { %824 = vmatprep.subr.mxu0 %v353_v0  ;;  %v478_v3 = vld [vmem:[%s1273_s5 + $0x78] sm:$0xff]  ;;  %v477_v4 = vld [vmem:[%s1273_s5 + $0x70] sm:$0xff]  ;;  %v350_v5 = vld [vmem:[%s1271_s3] sm:$0xff]  ;;  %s770_s24 = sshll.u32 %s1285_s25, 3  ;;  %s1220_s25 = scalar_lea.hbm %s1277_s9, %s787_s21 }
  0x15   : > { %825 = vmatpush3.msra.mxu0 %v353_v0  ;;  %838 = vmatprep.subr.mxu1 %v478_v3  ;;  %v476_v6 = vld [vmem:[%s1273_s5 + $0x68] sm:$0xff]  ;;  %v338_v7 = vld [vmem:[%s1269_s1] sm:$0xff]  ;;  %s331_s22 = scalar_lea.vmem %s1268_s0, %s770_s24  ;;  %v574_v12 = vld [vmem:[%s1275_s7 + $0x18] sm:$0xff]  ;;  %p933_p12 = pnand %p932_p11, %p1084_p5 }
  0x16   : > { %826 = vmatprep.subr.mxu0 %v352_v1  ;;  %839 = vmatpush3.msra.mxu1 %v478_v3  ;;  %v344_v8 = vld [vmem:[%s1270_s2] sm:$0xff]  ;;  %v339_v9 = vld [vmem:[%s1269_s1 + $0x8] sm:$0xff]  ;;  %v1137_v14 = vld [vmem:[%s331_s22 + $0x10] sm:$0xff]  ;;  %s937_s24 = scalar_lea.vmem %s936_s29, 1024  ;;  %p938_p0 = scmp.lt.s32.totalorder %s1222_s17, %s936_s29 }
  0x17   : > { %827 = vmatpush3.msra.mxu0 %v352_v1  ;;  %840 = vmatprep.subr.mxu1 %v477_v4  ;;  %v345_v10 = vld [vmem:[%s1270_s2 + $0x8] sm:$0xff]  ;;  %v475_v11 = vld [vmem:[%s1273_s5 + $0x60] sm:$0xff]  ;;  %v342_v17 = vmul.f32 %v338_v7, %v1137_v14  ;;  %v1143_v19 = vld [vmem:[%s331_s22 + $0x18] sm:$0xff]  ;;  %p934_p13 = pneg %p933_p12  ;;  %p939_p1 = scmp.lt.s32.totalorder %s937_s24, %s931_s26 }
  0x18   : > { %828 = vmatprep.subr.mxu0 %v351_v2  ;;  %841 = vmatpush3.msra.mxu1 %v477_v4  ;;  %v334_v13 = vld [vmem:[%s331_s22] sm:$0xff]  ;;  %v1139_v15 = vld [vmem:[%s331_s22 + $0x8] sm:$0xff]  ;;  %v474_v20 = vld [vmem:[%s1273_s5 + $0x58] sm:$0xff]  ;;  %v343_v21 = vmul.f32 %v339_v9, %v1143_v19 }
  0x19   : > { %829 = vmatpush3.msra.mxu0 %v351_v2  ;;  %842 = vmatprep.subr.mxu1 %v476_v6  ;;  %v340_v16 = vmul.f32 %v338_v7, %v334_v13  ;;  %v341_v18 = vmul.f32 %v339_v9, %v1139_v15  ;;  %v348_v23 = vadd.f32 %v344_v8, %v342_v17  ;;  %v473_v25 = vld [vmem:[%s1273_s5 + $0x50] sm:$0xff]  ;;  %v472_v26 = vld [vmem:[%s1273_s5 + $0x48] sm:$0xff]  ;;  %v471_v28 = vld [vmem:[%s1273_s5 + $0x40] sm:$0xff]  ;;  %p940_p2 = por %p939_p1, %p938_p0 }
  0x1a   : > { %830 = vmatprep.subr.mxu0 %v350_v5  ;;  %843 = vmatpush3.msra.mxu1 %v476_v6  ;;  %v349_v27 = vadd.f32 %v345_v10, %v343_v21  ;;  %v470_v29 = vld [vmem:[%s1273_s5 + $0x38] sm:$0xff]  ;;  %v469_v30 = vld [vmem:[%s1273_s5 + $0x30] sm:$0xff]  ;;  %v468_v31 = vld [vmem:[%s1273_s5 + $0x28] sm:$0xff] }
  0x1b   : > { %831 = vmatpush3.msra.mxu0 %v350_v5  ;;  %844 = vmatprep.subr.mxu1 %v475_v11  ;;  %v346_v22 = vadd.f32 %v344_v8, %v340_v16  ;;  %v347_v24 = vadd.f32 %v345_v10, %v341_v18  ;;  %v467_v32 = vld [vmem:[%s1273_s5 + $0x20] sm:$0xff]  ;;  %v466_v33 = vld [vmem:[%s1273_s5 + $0x18] sm:$0xff]  ;;  %v573_v34 = vld [vmem:[%s1275_s7 + $0x10] sm:$0xff]  ;;  %p941_p3 = pnand %p940_p2, %p934_p13 }
  0x1c   : > { %876 = vmatprep.subr.mxu0 %v574_v12  ;;  %845 = vmatpush3.msra.mxu1 %v475_v11  ;;  %v465_v35 = vld [vmem:[%s1273_s5 + $0x10] sm:$0xff]  ;;  %v572_v36 = vld [vmem:[%s1275_s7 + $0x8] sm:$0xff]  ;;  %v571_v38 = vld [vmem:[%s1275_s7] sm:$0xff] }
  0x1d   : > { %846 = vmatprep.subr.mxu1 %v474_v20  ;;  %832 = vmatprep.mubr.msk.f32.mxu0 %vm361_vm0, %v346_v22  ;;  %v464_v37 = vld [vmem:[%s1273_s5 + $0x8] sm:$0xff]  ;;  %v463_v39 = vld [vmem:[%s1273_s5] sm:$0xff] }
  0x1e   : > { %847 = vmatpush3.msra.mxu1 %v474_v20  ;;  %833 = vmatmul.mubr.msk.f32.vlgmr.msra.gmra.mxu0 %vm361_vm0, %v347_v24  ;;  %v771_v40 = vld [vmem:[%s1272_s4] ss:$0 sm:$0xff] }
  0x1f   : > { %848 = vmatprep.subr.mxu1 %v473_v25  ;;  %835 = vmatprep.mubr.msk.f32.mxu0 %vm361_vm0, %v348_v23  ;;  %v777_v54 = vld [vmem:[%s1276_s8] ss:$0 sm:$0xff] }
  0x20   : > { %849 = vmatpush3.msra.mxu1 %v473_v25  ;;  %877 = vmatpush3.msra.mxu0 %v574_v12  ;;  %v776_v56 = vld [vmem:[%s1274_s6] ss:$0 sm:$0xff] }
  0x21   : > { %850 = vmatprep.subr.mxu1 %v472_v26  ;;  %878 = vmatprep.subr.mxu0 %v573_v34 }
  0x22   : > { %851 = vmatpush3.msra.mxu1 %v472_v26  ;;  %836 = vmatmul.mubr.msk.f32.gmra.mxu0 %vm361_vm0, %v349_v27 }
  0x23   : > { %852 = vmatprep.subr.mxu1 %v471_v28  ;;  %884 = vmatprep.mubr.msk.f32.mxu0 %vm361_vm0, %v334_v13 }
  0x24   : > { %853 = vmatpush3.msra.mxu1 %v471_v28  ;;  %879 = vmatpush3.msra.mxu0 %v573_v34 }
  0x25   : > { %854 = vmatprep.subr.mxu1 %v470_v29  ;;  %880 = vmatprep.subr.mxu0 %v572_v36 }
  0x26   : > { %855 = vmatpush3.msra.mxu1 %v470_v29  ;;  %881 = vmatpush3.msra.mxu0 %v572_v36 }
  0x27   : > { %856 = vmatprep.subr.mxu1 %v469_v30  ;;  %882 = vmatprep.subr.mxu0 %v571_v38 }
  0x28   : > { %857 = vmatpush3.msra.mxu1 %v469_v30  ;;  %883 = vmatpush3.msra.mxu0 %v571_v38 }
  0x29   : > { %858 = vmatprep.subr.mxu1 %v468_v31  ;;  %885 = vmatmul.mubr.msk.f32.vlgmr.msra.gmra.mxu0 %vm361_vm0, %v1139_v15 }
  0x2a   : > { %859 = vmatpush3.msra.mxu1 %v468_v31  ;;  %887 = vmatprep.mubr.msk.f32.mxu0 %vm361_vm0, %v1137_v14 }
  0x2b   : > { %860 = vmatprep.subr.mxu1 %v467_v32 }
  0x2c   : > { %861 = vmatpush3.msra.mxu1 %v467_v32 }
  0x2d   : > { %862 = vmatprep.subr.mxu1 %v466_v33  ;;  %888 = vmatmul.mubr.msk.f32.gmra.mxu0 %vm361_vm0, %v1143_v19 }
  0x2e   : > { %863 = vmatpush3.msra.mxu1 %v466_v33 }
  0x2f   : > { %864 = vmatprep.subr.mxu1 %v465_v35 }
  0x30   : > { %865 = vmatpush3.msra.mxu1 %v465_v35 }
  0x31   : > { %866 = vmatprep.subr.mxu1 %v464_v37 }
  0x32   : > { %867 = vmatpush3.msra.mxu1 %v464_v37 }
  0x33   : > { %868 = vmatprep.subr.mxu1 %v463_v39 }
  0x34   : > { %869 = vmatpush3.msra.mxu1 %v463_v39 }
  0xde   : > { %v834_v41 = vpop.f32.mrf.mxu0 }
  0xdf   : > { %v446_v42 = vadd.f32 %v834_v41, %v771_v40 }
  0xe0   : > { %v440_v43 = vpop.f32.mrf.mxu0 }
  0xe1   : > { %v441_v44 = vadd.f32 %v771_v40, %v440_v43  ;;  %v460_v47 = vmax.f32 %v446_v42, 0.0 }
  0xe2   : > { %v837_v45 = vpop.f32.mrf.mxu0 }
  0xe3   : > { %v459_v46 = vmax.f32 %v441_v44, 0.0  ;;  %v456_v48 = vadd.f32 %v837_v45, %v771_v40 }
  0xe4   : > { %v450_v49 = vpop.f32.mrf.mxu0 }
  0xe5   : > { %v451_v50 = vadd.f32 %v771_v40, %v450_v49  ;;  %870 = vmatprep.mubr.f32.mxu1 %v459_v46  ;;  %v462_v52 = vmax.f32 %v456_v48, 0.0 }
  0xe6   : > { %871 = vmatmul.mubr.f32.vlgmr.msra.gmra.mxu1 %v460_v47 }
  0xe7   : > { %v461_v51 = vmax.f32 %v451_v50, 0.0 }
  0xe9   : > { %873 = vmatprep.mubr.f32.mxu1 %v461_v51  ;;  %v886_v53 = vpop.f32.mrf.mxu0 }
  0xea   : > { %874 = vmatmul.mubr.f32.gmra.mxu1 %v462_v52  ;;  %v666_v57 = vadd.f32 %v886_v53, %v777_v54 }
  0xeb   : > { %v660_v55 = vpop.f32.mrf.mxu0 }
  0xec   : > { %v661_v63 = vadd.f32 %v777_v54, %v660_v55 }
  0xed   : > { %v889_v59 = vpop.f32.mrf.mxu0 }
  0xee   : > { %v676_v1 = vadd.f32 %v889_v59, %v777_v54 }
  0xef   : > { %v670_v3 = vpop.f32.mrf.mxu0 }
  0xf0   : > { %v671_v8 = vadd.f32 %v777_v54, %v670_v3 }
 0x1a6   : > { %v872_v58 = vpop.f32.mrf.mxu1 }
 0x1a7   : > { %v558_v60 = vadd.f32 %v872_v58, %v776_v56 }
 0x1a8   : > { %v552_v61 = vpop.f32.mrf.mxu1 }
 0x1a9   : > { %v680_v62 = vadd.f32 %v666_v57, %v558_v60  ;;  %v553_v0 = vadd.f32 %v776_v56, %v552_v61 }
 0x1aa   : > { %v875_v2 = vpop.f32.mrf.mxu1 }
 0x1ab   : > { %685 = vst.msk [vmem:[%s326_s16 + $0x8] sm:$0xff] %vm683_vm1, %v680_v62  ;;  %v679_v4 = vadd.f32 %v661_v63, %v553_v0  ;;  %v568_v5 = vadd.f32 %v875_v2, %v776_v56 }
 0x1ac   : > { %v562_v6 = vpop.f32.mrf.mxu1 }
 0x1ad   : > { %684 = vst.msk [vmem:[%s326_s16] sm:$0xff] %vm683_vm1, %v679_v4  ;;  %v682_v7 = vadd.f32 %v676_v1, %v568_v5  ;;  %v563_v9 = vadd.f32 %v776_v56, %v562_v6 }
 0x1af   : > { %687 = vst.msk [vmem:[%s326_s16 + $0x18] sm:$0xff] %vm683_vm1, %v682_v7  ;;  %v681_v10 = vadd.f32 %v671_v8, %v563_v9 }
 0x1b1   : > { %686 = vst.msk [vmem:[%s326_s16 + $0x10] sm:$0xff] %vm683_vm1, %v681_v10 }
 0x1b2   : > { %944 = shalt.err (!%p941_p3)
}
 0x1b3   : > { %s945_s28 = scalar_lea.hbm %s1220_s25, 512  ;;  %s949_s21 = scalar_lea.hbm %s1277_s9, 1024 }
 0x1b4   : > { %p946_p4 = scmp.ne.s32.totalorder %s1220_s25, %s945_s28  ;;  %p950_p9 = scmp.lt.s32.totalorder %s1220_s25, %s1277_s9 }
 0x1b5   : > { %p951_p10 = scmp.lt.s32.totalorder %s949_s21, %s945_s28 }
 0x1b6   : > { %p947_p7 = pnand %p946_p4, %p1084_p5 }
 0x1b7   : > { %p952_p11 = por %p951_p10, %p950_p9 }
 0x1b8   : > { %p948_p8 = pneg %p947_p7 }
 0x1ba   : > { %p953_p12 = pnand %p952_p11, %p948_p8 }
 0x1bc   : > { %956 = shalt.err (!%p953_p12)
}
 0x1bd   : > { %s994_s26 = smov 128   ;;  %s995_s27 = smov 8  }
 0x1be   : > { %890 = dma.vmem_to_hbm [thread:$0]  (%p1084_p5), %s1222_s17, 512, %s1220_s25, %s1228_s13, %s994_s26, %s994_s26, %s995_s27  }
 0x1bf PF: > { %p896_p13 = scmp.ge.s32.totalorder %s991_s12, 2  ;;  %s717_s29 = sand.u32 1, %s979_s30  }
 0x1c0   : > { %s718_s24 = scalar_lea.sflag [#allocation3], %s717_s29 }
 0x1c1   : > { %p893_p0 = pnand %p896_p13, %p1088_p6 }
 0x1c3   : > { %p894_p1 = pneg %p893_p0 }
 0x1c5   : > { %974 = dma.done.wait (%p894_p1), %s718_s24, 512  }
 0x1c6   : > { %976 = vsyncadd (%p894_p1), %s718_s24, 4294966784  ;;  %p19_p2 = scmp.ge.s32.totalorder %s1071_s15, 4   ;;  %s1280_s30 = smov %s983_s10 }
 0x1c7   : > { %s1281_s10 = smov %s987_s11  ;;  %s1282_s11 = smov %s1082_s18 }
 0x1c8   : > { %s1283_s12 = smov %s1071_s15  ;;  %21 = sbr.rel (!%p19_p2) target bundleno = 3 (0x3), region = 91 }
 0x1cd   :  { %723 = vsyncpa [#allocation3], 1 }
 0x1ce   :  { %725 = vsyncpa [#allocation3 + $0x1], 1 }

</bundles_post_ra>
